<compile_context>
chip_gen: v5e
topology: v5e:2x2
jax: 0.10.0
libtpu: 0.0.40
codegen_flags: <defaults>
</compile_context>

<pallas_src>
import jax
import jax.numpy as jnp
from jax.experimental import pallas as pl
from jax.experimental.pallas import tpu as pltpu


def _round_up(n, m):
    return ((n + m - 1) // m) * m


def _make_mlp_kernel(num_linear_layers):
    """Build a fused MLP kernel for `num_linear_layers` Linear layers.

    Kernel ref order: x, w0, b0, w1, b1, ..., w_{L-1}, b_{L-1}, out
    """

    def kernel(*refs):
        x_ref = refs[0]
        o_ref = refs[-1]
        param_refs = refs[1:-1]
        compute_dtype = x_ref.dtype

        h = x_ref[...]                                   # (tile, in_p), compute dtype
        for i in range(num_linear_layers):
            w = param_refs[2 * i][...]                   # (in_p, out_p), compute dtype
            b = param_refs[2 * i + 1][...]               # (1, out_p), float32
            acc = jnp.dot(h, w, preferred_element_type=jnp.float32) + b
            if i < num_linear_layers - 1:
                acc = jnp.maximum(acc, 0.0)              # ReLU
                # Dropout(p=0.3): identity in eval/inference mode.
                h = acc.astype(compute_dtype)            # low-precision feed to next MXU pass
            else:
                h = acc                                  # keep f32 accumulation for output
        o_ref[...] = h.astype(o_ref.dtype)

    return kernel


def _choose_batch_tile(batch, max_width_padded):
    """Largest batch tile whose live f32 activation footprint stays modest,
    multiple of 16 (bf16 sublane packing), keeping >=2 grid steps when the
    batch is large enough so both v7x TensorCores are used."""
    tile = 512
    # live f32 activation (tile x widest layer) should stay well under scoped VMEM
    while tile > 128 and tile * max_width_padded * 4 > (8 << 20):
        tile //= 2
    batch_rounded = _round_up(batch, 16)
    if batch_rounded >= 2 * 128:
        tile = min(tile, _round_up(batch_rounded // 2, 16))
    tile = min(tile, batch_rounded)
    return max(16, tile)


def dnn_forward(x, weights, biases, *, batch_tile=None, compute_dtype=jnp.bfloat16):
    """Run the fused MLP Pallas kernel.

    Args:
      x:        (batch, input_size) float32
      weights:  list of (in_features, out_features) float32 arrays
                (transposed PyTorch Linear weights, so the kernel does x @ W + b)
      biases:   list of (1, out_features) float32 arrays
      batch_tile: rows of x per grid step (auto-chosen if None)
      compute_dtype: matmul operand dtype (bf16 default, f32 accumulation)
    """
    batch, in_features = x.shape
    num_layers = len(weights)
    output_size = weights[-1].shape[1]
    out_dtype = x.dtype

    # --- lane-dense padding of every feature dim to a multiple of 128 -------
    dims = [in_features] + [w.shape[1] for w in weights]
    pdims = [_round_up(d, 128) for d in dims]
    max_width = max(pdims)

    if batch_tile is None:
        batch_tile = _choose_batch_tile(batch, max_width)
    pbatch = _round_up(batch, batch_tile)

    xp = jnp.pad(x, ((0, pbatch - batch), (0, pdims[0] - in_features))).astype(compute_dtype)
    wp, bp = [], []
    for i, (w, b) in enumerate(zip(weights, biases)):
        wp.append(
            jnp.pad(w, ((0, pdims[i] - w.shape[0]), (0, pdims[i + 1] - w.shape[1])))
            .astype(compute_dtype)
        )
        bp.append(
            jnp.pad(b, ((0, 0), (0, pdims[i + 1] - b.shape[1]))).astype(jnp.float32)
        )

    kernel = _make_mlp_kernel(num_layers)

    # x / out are tiled over the batch; all weights & biases are fully
    # VMEM-resident every grid step (their block index never changes).
    in_specs = [pl.BlockSpec((batch_tile, pdims[0]), lambda i: (i, 0))]
    operands = [xp]
    for w, b in zip(wp, bp):
        in_specs.append(pl.BlockSpec(w.shape, lambda i: (0, 0)))
        in_specs.append(pl.BlockSpec(b.shape, lambda i: (0, 0)))
        operands.append(w)
        operands.append(b)
    out_spec = pl.BlockSpec((batch_tile, pdims[-1]), lambda i: (i, 0))

    # --- VMEM budget & cost estimate -----------------------------------------
    param_bytes = sum(int(a.size) * a.dtype.itemsize for a in wp + bp)
    tile_bytes = batch_tile * (pdims[0] + pdims[-1]) * jnp.dtype(compute_dtype).itemsize
    act_bytes = batch_tile * max_width * 4  # live fp32 activation value
    vmem_limit = 2 * param_bytes + 4 * tile_bytes + 4 * act_bytes + (8 << 20)
    vmem_limit = int(max(32 << 20, min(vmem_limit, 64 << 20)))  # safe on v5e/v6e/v7x

    flops = 2 * pbatch * sum(pdims[i] * pdims[i + 1] for i in range(num_layers))
    bytes_accessed = (
        int(xp.size) * xp.dtype.itemsize
        + param_bytes
        + pbatch * pdims[-1] * jnp.dtype(jnp.float32).itemsize
    )
    cost = pl.CostEstimate(flops=flops, transcendentals=0, bytes_accessed=bytes_accessed)

    out_padded = pl.pallas_call(
        kernel,
        out_shape=jax.ShapeDtypeStruct((pbatch, pdims[-1]), jnp.float32),
        grid_spec=pltpu.PrefetchScalarGridSpec(
            num_scalar_prefetch=0,
            grid=(pbatch // batch_tile,),
            in_specs=in_specs,
            out_specs=out_spec,
        ),
        compiler_params=pltpu.CompilerParams(
            dimension_semantics=("parallel",),
            vmem_limit_bytes=vmem_limit,
        ),
        cost_estimate=cost,
    )(*operands)

    return out_padded[:batch, :output_size].astype(out_dtype)


def init_params(key, input_size, hidden_layers, output_size):
    """Deterministic synthetic init matching the PyTorch layer shapes."""
    dims = [input_size] + list(hidden_layers) + [output_size]
    weights, biases = [], []
    for i in range(len(dims) - 1):
        key, kw, kb = jax.random.split(key, 3)
        fan_in, fan_out = dims[i], dims[i + 1]
        bound = 1.0 / jnp.sqrt(fan_in)
        # PyTorch Linear stores (out, in); we store transposed (in, out).
        w = jax.random.uniform(kw, (fan_in, fan_out), jnp.float32, -bound, bound)
        b = jax.random.uniform(kb, (1, fan_out), jnp.float32, -bound, bound)
        weights.append(w)
        biases.append(b)
    return weights, biases


def dnn_forward_ref(x, weights, biases):
    """Plain-JAX reference (eval mode: dropout = identity)."""
    h = x
    for i, (w, b) in enumerate(zip(weights, biases)):
        h = h @ w + b
        if i < len(weights) - 1:
            h = jnp.maximum(h, 0.0)
    return h


if __name__ == "__main__":
    # Small shapes consistent with the module; batch large enough for two
    # 128-row tiles so the parallel batch axis exercises both v7x cores.
    input_size = 32
    hidden_layers = [64, 32]
    output_size = 8
    batch = 256

    key = jax.random.PRNGKey(0)
    key, kx = jax.random.split(key)
    x = jax.random.normal(kx, (batch, input_size), jnp.float32)
    weights, biases = init_params(key, input_size, hidden_layers, output_size)

    ref = dnn_forward_ref(x, weights, biases)

    # float32 compute path: tight check against the reference.
    out_f32 = jax.block_until_ready(
        dnn_forward(x, weights, biases, compute_dtype=jnp.float32)
    )
    assert out_f32.shape == (batch, output_size)
    assert jnp.allclose(out_f32, ref, atol=1e-4, rtol=1e-4), "f32 mismatch vs reference"

    # bf16 compute path (default, MXU-rate): looser tolerance.
    out_bf16 = jax.block_until_ready(dnn_forward(x, weights, biases))
    assert out_bf16.shape == (batch, output_size)
    assert jnp.allclose(out_bf16, ref, atol=5e-2, rtol=5e-2), "bf16 mismatch vs reference"

    print("KERNEL_OK")
</pallas_src>

<mosaic_0001>
module attributes {stable_mosaic.version = 11 : i64} {
  func.func @kernel(%arg0: i32, %arg1: memref<128x128xf32, #tpu.memory_space<vmem>>, %arg2: memref<128x128xf32, #tpu.memory_space<vmem>>, %arg3: memref<1x128xf32, #tpu.memory_space<vmem>>, %arg4: memref<128x128xf32, #tpu.memory_space<vmem>>, %arg5: memref<1x128xf32, #tpu.memory_space<vmem>>, %arg6: memref<128x128xf32, #tpu.memory_space<vmem>>, %arg7: memref<1x128xf32, #tpu.memory_space<vmem>>, %arg8: memref<128x128xf32, #tpu.memory_space<vmem>>) attributes {dimension_semantics = [#tpu.dimension_semantics<parallel>], iteration_bounds = array<i64: 2>, scalar_prefetch = 0 : i64, scratch_operands = 0 : i64, tpu.core_type = #tpu.core_type<tc>, window_params = [{transform_indices = @transform_0, window_bounds = array<i64: 128, 128>}, {pipeline_mode = #tpu.pipeline_mode<synchronous>, transform_indices = @transform_1, window_bounds = array<i64: 128, 128>}, {pipeline_mode = #tpu.pipeline_mode<synchronous>, transform_indices = @transform_2, window_bounds = array<i64: 1, 128>}, {pipeline_mode = #tpu.pipeline_mode<synchronous>, transform_indices = @transform_3, window_bounds = array<i64: 128, 128>}, {pipeline_mode = #tpu.pipeline_mode<synchronous>, transform_indices = @transform_4, window_bounds = array<i64: 1, 128>}, {pipeline_mode = #tpu.pipeline_mode<synchronous>, transform_indices = @transform_5, window_bounds = array<i64: 128, 128>}, {pipeline_mode = #tpu.pipeline_mode<synchronous>, transform_indices = @transform_6, window_bounds = array<i64: 1, 128>}, {transform_indices = @transform_7, window_bounds = array<i64: 128, 128>}]} {
    %c0 = arith.constant 0 : index
    %c0_0 = arith.constant 0 : index
    %0 = vector.load %arg1[%c0, %c0_0] : memref<128x128xf32, #tpu.memory_space<vmem>>, vector<128x128xf32>
    %c0_1 = arith.constant 0 : index
    %c0_2 = arith.constant 0 : index
    %1 = vector.load %arg2[%c0_1, %c0_2] : memref<128x128xf32, #tpu.memory_space<vmem>>, vector<128x128xf32>
    %c0_3 = arith.constant 0 : index
    %c0_4 = arith.constant 0 : index
    %2 = vector.load %arg3[%c0_3, %c0_4] : memref<1x128xf32, #tpu.memory_space<vmem>>, vector<1x128xf32>
    %cst = arith.constant dense<0.000000e+00> : vector<128x128xf32>
    %3 = tpu.matmul %0, %1, %cst {dimension_numbers = #tpu.dot_dimension_numbers<[1], [0], [0], [1], [0, 0, 1, 1], [], []>} : vector<128x128xf32>, vector<128x128xf32>, vector<128x128xf32> -> vector<128x128xf32>
    %4 = vector.broadcast %2 : vector<1x128xf32> to vector<128x128xf32>
    %5 = arith.addf %3, %4 : vector<128x128xf32>
    %cst_5 = arith.constant 0.000000e+00 : f32
    %6 = vector.broadcast %cst_5 : f32 to vector<128x128xf32>
    %7 = arith.maximumf %5, %6 : vector<128x128xf32>
    %c0_6 = arith.constant 0 : index
    %c0_7 = arith.constant 0 : index
    %8 = vector.load %arg4[%c0_6, %c0_7] : memref<128x128xf32, #tpu.memory_space<vmem>>, vector<128x128xf32>
    %c0_8 = arith.constant 0 : index
    %c0_9 = arith.constant 0 : index
    %9 = vector.load %arg5[%c0_8, %c0_9] : memref<1x128xf32, #tpu.memory_space<vmem>>, vector<1x128xf32>
    %cst_10 = arith.constant dense<0.000000e+00> : vector<128x128xf32>
    %10 = tpu.matmul %7, %8, %cst_10 {dimension_numbers = #tpu.dot_dimension_numbers<[1], [0], [0], [1], [0, 0, 1, 1], [], []>} : vector<128x128xf32>, vector<128x128xf32>, vector<128x128xf32> -> vector<128x128xf32>
    %11 = vector.broadcast %9 : vector<1x128xf32> to vector<128x128xf32>
    %12 = arith.addf %10, %11 : vector<128x128xf32>
    %cst_11 = arith.constant 0.000000e+00 : f32
    %13 = vector.broadcast %cst_11 : f32 to vector<128x128xf32>
    %14 = arith.maximumf %12, %13 : vector<128x128xf32>
    %c0_12 = arith.constant 0 : index
    %c0_13 = arith.constant 0 : index
    %15 = vector.load %arg6[%c0_12, %c0_13] : memref<128x128xf32, #tpu.memory_space<vmem>>, vector<128x128xf32>
    %c0_14 = arith.constant 0 : index
    %c0_15 = arith.constant 0 : index
    %16 = vector.load %arg7[%c0_14, %c0_15] : memref<1x128xf32, #tpu.memory_space<vmem>>, vector<1x128xf32>
    %cst_16 = arith.constant dense<0.000000e+00> : vector<128x128xf32>
    %17 = tpu.matmul %14, %15, %cst_16 {dimension_numbers = #tpu.dot_dimension_numbers<[1], [0], [0], [1], [0, 0, 1, 1], [], []>} : vector<128x128xf32>, vector<128x128xf32>, vector<128x128xf32> -> vector<128x128xf32>
    %18 = vector.broadcast %16 : vector<1x128xf32> to vector<128x128xf32>
    %19 = arith.addf %17, %18 : vector<128x128xf32>
    %c0_17 = arith.constant 0 : index
    %c0_18 = arith.constant 0 : index
    %20 = vector.load %arg8[%c0_17, %c0_18] : memref<128x128xf32, #tpu.memory_space<vmem>>, vector<128x128xf32>
    tpu.vector_store %arg8[%c0_17, %c0_18], %19 {strides = array<i32>} : memref<128x128xf32, #tpu.memory_space<vmem>>, vector<128x128xf32>,
    return
  }
  func.func @transform_0(%arg0: i32) -> (i32, i32) {
    %c0_i32 = arith.constant 0 : i32
    %c0_i32_0 = arith.constant 0 : i32
    return %arg0, %c0_i32 : i32, i32
  }
  func.func @transform_1(%arg0: i32) -> (i32, i32) {
    %c0_i32 = arith.constant 0 : i32
    %c0_i32_0 = arith.constant 0 : i32
    %c0_i32_1 = arith.constant 0 : i32
    return %c0_i32, %c0_i32_0 : i32, i32
  }
  func.func @transform_2(%arg0: i32) -> (i32, i32) {
    %c0_i32 = arith.constant 0 : i32
    %c0_i32_0 = arith.constant 0 : i32
    %c0_i32_1 = arith.constant 0 : i32
    return %c0_i32, %c0_i32_0 : i32, i32
  }
  func.func @transform_3(%arg0: i32) -> (i32, i32) {
    %c0_i32 = arith.constant 0 : i32
    %c0_i32_0 = arith.constant 0 : i32
    %c0_i32_1 = arith.constant 0 : i32
    return %c0_i32, %c0_i32_0 : i32, i32
  }
  func.func @transform_4(%arg0: i32) -> (i32, i32) {
    %c0_i32 = arith.constant 0 : i32
    %c0_i32_0 = arith.constant 0 : i32
    %c0_i32_1 = arith.constant 0 : i32
    return %c0_i32, %c0_i32_0 : i32, i32
  }
  func.func @transform_5(%arg0: i32) -> (i32, i32) {
    %c0_i32 = arith.constant 0 : i32
    %c0_i32_0 = arith.constant 0 : i32
    %c0_i32_1 = arith.constant 0 : i32
    return %c0_i32, %c0_i32_0 : i32, i32
  }
  func.func @transform_6(%arg0: i32) -> (i32, i32) {
    %c0_i32 = arith.constant 0 : i32
    %c0_i32_0 = arith.constant 0 : i32
    %c0_i32_1 = arith.constant 0 : i32
    return %c0_i32, %c0_i32_0 : i32, i32
  }
  func.func @transform_7(%arg0: i32) -> (i32, i32) {
    %c0_i32 = arith.constant 0 : i32
    %c0_i32_0 = arith.constant 0 : i32
    return %arg0, %c0_i32 : i32, i32
  }
}

</mosaic_0001>

<bundles_post_ra>
// kernel: tpu_custom_call.1
= control target key start
LH: loop header
LB: loop body
LE: loop exit
PB: predicated region body
PF: predicated region fallthrough
CT: control target
= control target key end

     0   :  { %s1423_s0 = inlined_call_operand.hbm [shape: f32[256,128], index: 0, kind: input, shape index: {}]   ;;  %s1424_s1 = inlined_call_operand.hbm [shape: f32[128,128], index: 1, kind: input, shape index: {}]   ;;  %s1425_s2 = inlined_call_operand.vmem [shape: f32[1,128], index: 2, kind: input, shape index: {}]   ;;  %s1426_s3 = inlined_call_operand.hbm [shape: f32[128,128], index: 3, kind: input, shape index: {}]   ;;  %s1427_s4 = inlined_call_operand.vmem [shape: f32[1,128], index: 4, kind: input, shape index: {}]   ;;  %s1428_s5 = inlined_call_operand.hbm [shape: f32[128,128], index: 5, kind: input, shape index: {}]   ;;  %s1429_s6 = inlined_call_operand.vmem [shape: f32[1,128], index: 6, kind: input, shape index: {}]   ;;  %s1430_s7 = inlined_call_operand.hbm [shape: f32[256,128], index: 7, kind: output, shape index: {}]  }
   0x1   :  { %1433 = sst [smem:[#allocation15_spill]] %s1424_s1 }
   0x2   :  { %12 = vsyncpa [#allocation3], 0 }
   0x3   :  { %14 = vsyncpa [#allocation3 + $0x1], 0 }
   0x4   :  { %15 = vsyncpa [#allocation6], 0 }
   0x5   :  { %16 = vsyncpa [#allocation9], 0 }
   0x6   :  { %17 = vsyncpa [#allocation4], 0 }
   0x7   :  { %19 = vsyncpa [#allocation4 + $0x1], 0  ;;  %s1185_s24 = smov 0   ;;  %s1187_s25 = smov 0  }
   0x8   :  { %s1189_s26 = smov 0   ;;  %s1191_s27 = smov 0  }
   0x9 LB: > { %s1206_s28 = sadd.s32 4294967295, %s1136_s27   ;;  %s788_s29 = sadd.s32 4294967294, %s1136_s27   ;;  %s1136_s27 = sphi %s1191_s27, %s1447_s27   ;;  %s1132_s26 = sphi %s1189_s26, %s1446_s26   ;;  %s1128_s25 = sphi %s1187_s25, %s1445_s25   ;;  %s1124_s24 = sphi %s1185_s24, %s1444_s24  }
   0xa   : > { %p45_p0 = scmp.ne.s32.totalorder %s1128_s25, %s1124_s24  ;;  %p46_p1 = scmp.eq.s32.totalorder %s1206_s28, 0 }
   0xb   : > { %p195_p2 = scmp.eq.s32.totalorder %s1206_s28, 1  ;;  %p201_p3 = scmp.eq.s32.totalorder %s788_s29, 1 }
   0xc   : > { %p1215_p4 = por %p46_p1, %p45_p0  ;;  %p789_p5 = scmp.ge.s32.totalorder %s1136_s27, 1 }
   0xd   : > { %p1220_p6 = por %p201_p3, %p45_p0  ;;  %p208_p7 = scmp.lt.s32.totalorder %s1136_s27, 3 }
   0xe   : > { %s1436_s1 = sld [smem:[#allocation15_spill]]  ;;  %s1138_s13 = smov [#allocation5]  }
   0xf   : > { %p1228_p8 = pnand %p789_p5, %p208_p7  ;;  %s221_s14 = sshll.u32 %s1138_s13, 4  ;;  %s222_s14 = int_to_ptr.vmem [resolvable:$true] %s221_s14 }
  0x10   : > { %s236_s18 = sshll.u32 %s1426_s3, 4  ;;  %s1431_s19 = smov 128   ;;  %s237_s18 = int_to_ptr.hbm [resolvable:$true] %s236_s18 }
  0x11   : > { %p874_p9 = pneg %p1228_p8  ;;  %s1432_s20 = smov 8  }
  0x12   : > { %s1141_s21 = smov [#allocation7]   ;;  %s253_s9 = sshll.u32 %s1428_s5, 4  ;;  %s254_s9 = int_to_ptr.hbm [resolvable:$true] %s253_s9 }
  0x13   : > { %p1236_p10 = pnand %p874_p9, %p46_p1  ;;  %s238_s22 = sshll.u32 %s1141_s21, 4  ;;  %s239_s22 = int_to_ptr.vmem [resolvable:$true] %s238_s22 }
  0x14   : > { %s219_s11 = sshll.u32 %s1436_s1, 4  ;;  %s1142_s10 = smov [#allocation8]   ;;  %s220_s11 = int_to_ptr.hbm [resolvable:$true] %s219_s11 }
  0x15   : > { %877 = dma.hbm_to_vmem [thread:$0]  (!%p1236_p10), %s220_s11, 2048, %s222_s14, [#allocation6], %s1431_s19, %s1431_s19, %s1432_s20  }
  0x16   : > { %880 = dma.hbm_to_vmem [thread:$0]  (!%p1236_p10), %s237_s18, 2048, %s239_s22, [#allocation6], %s1431_s19, %s1431_s19, %s1432_s20  }
  0x17   : > { %s255_s11 = sshll.u32 %s1142_s10, 4  ;;  %s1258_s13 = sadd.s32 1, %s1136_s27   ;;  %s256_s11 = int_to_ptr.vmem [resolvable:$true] %s255_s11 }
  0x18   : > { %883 = dma.hbm_to_vmem [thread:$0]  (!%p1236_p10), %s254_s9, 2048, %s256_s11, [#allocation9], %s1431_s19, %s1431_s19, %s1432_s20  }
  0x19   : > { %s29_s14 = ssub.s32 %s1136_s27, %s1258_s13  ;;  %s32_s16 = sadd.s32 1, %s1132_s26 }
  0x1a   : > { %p30_p12 = scmp.eq.s32.totalorder %s29_s14, 0  ;;  %p39_p13 = scmp.ne.s32.totalorder %s1132_s26, %s1128_s25 }
  0x1b   : > { %p40_p0 = scmp.eq.s32.totalorder %s1136_s27, 0  ;;  %p895_p5 = scmp.lt.s32.totalorder %s1136_s27, 2 }
  0x1c   : > { %s1272_s17 = scalar_select %p30_p12, %s1132_s26, %s32_s16  }
  0x1d   : > { %p1276_p3 = por %p195_p2, %p39_p13  ;;  %s272_s21 = sand.u32 1, %s1132_s26  }
  0x1e   : > { %s808_s15 = sshll.u32 %s1136_s27, 7  ;;  %p41_p7 = por %p40_p0, %p39_p13 }
  0x1f   : > { %s794_s22 = sshll.u32 %s272_s21, 7  ;;  %s281_s9 = scalar_lea.hbm %s1423_s0, %s808_s15 }
  0x20   : > { %s282_s10 = sshll.u32 %s281_s9, 4  ;;  %s276_s11 = scalar_lea.vmem [#allocation2], %s794_s22  ;;  %s283_s10 = int_to_ptr.hbm [resolvable:$true] %s282_s10 }
  0x21   : > { %s284_s14 = sshll.u32 %s276_s11, 4  ;;  %p1286_p9 = pnand %p895_p5, %p41_p7  ;;  %s285_s14 = int_to_ptr.vmem [resolvable:$true] %s284_s14 }
  0x22   : > { %s273_s19 = scalar_lea.sflag [#allocation3], %s272_s21  ;;  %s1032_s20 = sshra.s32 %s283_s10, 4  ;;  %s1033_s20 = int_to_ptr.hbm [resolvable:$true] %s1032_s20 }
  0x23   : > { %s1034_s1 = scalar_lea.hbm %s1033_s20, 128  ;;  %p1036_p10 = pneg %p1286_p9 }
  0x24   : > { %p1035_p2 = scmp.ne.s32.totalorder %s1033_s20, %s1034_s1  ;;  %s1039_s22 = scalar_lea.hbm %s1423_s0, 256 }
  0x25   : > { %p1040_p0 = scmp.lt.s32.totalorder %s1033_s20, %s1423_s0  ;;  %p1041_p5 = scmp.lt.s32.totalorder %s1039_s22, %s1034_s1 }
  0x26   : > { %p1037_p12 = pnand %p1036_p10, %p1035_p2 }
  0x27   : > { %p1042_p7 = por %p1041_p5, %p1040_p0 }
  0x28   : > { %p1038_p13 = pneg %p1037_p12 }
  0x2a   : > { %p1043_p11 = pnand %p1042_p7, %p1038_p13 }
  0x2c   : > { %1046 = shalt.err (!%p1043_p11)
}
  0x2d   : > { %s1441_s21 = smov 8   ;;  %s1442_s11 = smov 128  }
  0x2e   : > { %887 = dma.hbm_to_vmem [thread:$0]  (!%p1286_p9), %s283_s10, 2048, %s285_s14, %s273_s19, %s1442_s11, %s1442_s11, %s1441_s21  }
  0x2f   : > { %296 = sbr.rel (%p1228_p8) target bundleno = 575 (0x23f), region = 48  ;;  %s1306_s15 = sand.u32 (!%p1228_p8), 1, %s1128_s25  }
  0x30   : > { %s798_s1 = sshll.u32 (!%p1228_p8), %s1306_s15, 7  ;;  %s299_s20 = scalar_lea.sflag (!%p1228_p8), [#allocation3], %s1306_s15 }
  0x31   : > { %s1312_s23 = scalar_lea.vmem (!%p1228_p8), [#allocation2], %s798_s1 }
  0x34   : > { %1107 = dma.done.wait (%p1215_p4), %s299_s20, 2048  }
  0x35   : > { %1109 = vsyncadd (%p1215_p4), %s299_s20, 4294965248 }
  0x36   : > { %1111 = dma.done.wait (%p46_p1), [#allocation6], 4096  }
  0x37   : > { %1113 = vsyncadd (%p46_p1), [#allocation6], 4294963200 }
  0x38   : > { %1115 = dma.done.wait (%p46_p1), [#allocation9], 2048  }
  0x39   : > { %1117 = vsyncadd (%p46_p1), [#allocation9], 4294965248  ;;  %v382_v0 = vld [vmem:[#allocation5 + $0x78] sm:$0xff]  ;;  %v381_v1 = vld [vmem:[#allocation5 + $0x70] sm:$0xff]  ;;  %s1371_s22 = scalar_lea.vmem [#allocation10], %s798_s1  ;;  %s809_s29 = sshll.u32 %s1206_s28, 7 }
  0x3a   : > { %387 = vmatpush.msra.mxu0 %v382_v0  ;;  %810 = vmatpush.msra.mxu3 %v382_v0  ;;  %v380_v2 = vld [vmem:[#allocation5 + $0x68] sm:$0xff]  ;;  %v379_v3 = vld [vmem:[#allocation5 + $0x60] sm:$0xff]  ;;  %v378_v4 = vld [vmem:[#allocation5 + $0x58] sm:$0xff]  ;;  %s682_s11 = scalar_lea.hbm %s1430_s7, %s809_s29  ;;  %s683_s1 = sshll.u32 %s1371_s22, 4  ;;  %s684_s1 = int_to_ptr.vmem [resolvable:$true] %s683_s1 }
  0x3b   : > { %v377_v5 = vld [vmem:[#allocation5 + $0x50] sm:$0xff]  ;;  %v376_v6 = vld [vmem:[#allocation5 + $0x48] sm:$0xff]  ;;  %v375_v7 = vld [vmem:[#allocation5 + $0x40] sm:$0xff]  ;;  %s685_s20 = sshll.u32 %s682_s11, 4  ;;  %s1082_s10 = scalar_lea.hbm %s1430_s7, 256  ;;  %s686_s20 = int_to_ptr.hbm [resolvable:$true] %s685_s20 }
  0x3c   : > { %388 = vmatpush.msra.mxu0 %v381_v1  ;;  %811 = vmatpush.msra.mxu3 %v381_v1  ;;  %v374_v8 = vld [vmem:[#allocation5 + $0x38] sm:$0xff]  ;;  %v373_v9 = vld [vmem:[#allocation5 + $0x30] sm:$0xff]  ;;  %v372_v10 = vld [vmem:[#allocation5 + $0x28] sm:$0xff]  ;;  %s1076_s30 = sshra.s32 %s686_s20, 4  ;;  %s1077_s30 = int_to_ptr.hbm [resolvable:$true] %s1076_s30 }
  0x3d   : > { %v371_v11 = vld [vmem:[#allocation5 + $0x20] sm:$0xff]  ;;  %v370_v12 = vld [vmem:[#allocation5 + $0x18] sm:$0xff]  ;;  %v369_v13 = vld [vmem:[#allocation5 + $0x10] sm:$0xff]  ;;  %s1078_s12 = scalar_lea.hbm %s1077_s30, 128  ;;  %p1083_p11 = scmp.lt.s32.totalorder %s1077_s30, %s1430_s7 }
  0x3e   : > { %389 = vmatpush.msra.mxu0 %v380_v2  ;;  %812 = vmatpush.msra.mxu3 %v380_v2  ;;  %v368_v14 = vld [vmem:[#allocation5 + $0x8] sm:$0xff]  ;;  %v367_v15 = vld [vmem:[#allocation5] sm:$0xff]  ;;  %v353_v18 = vld [vmem:[%s1312_s23 + $0x10] sm:$0xff]  ;;  %p1079_p1 = scmp.ne.s32.totalorder %s1077_s30, %s1078_s12  ;;  %p1084_p9 = scmp.lt.s32.totalorder %s1082_s10, %s1078_s12 }
  0x3f   : > { %v351_v16 = vld [vmem:[%s1312_s23] sm:$0xff]  ;;  %v352_v17 = vld [vmem:[%s1312_s23 + $0x8] sm:$0xff]  ;;  %v354_v20 = vld [vmem:[%s1312_s23 + $0x18] sm:$0xff] }
  0x40   : > { %390 = vmatpush.msra.mxu0 %v379_v3  ;;  %813 = vmatpush.msra.mxu3 %v379_v3  ;;  %v363_v19 = vld [vmem:[%s1312_s23 + $0x60] sm:$0xff]  ;;  %v364_v21 = vld [vmem:[%s1312_s23 + $0x68] sm:$0xff]  ;;  %v365_v23 = vld [vmem:[%s1312_s23 + $0x70] sm:$0xff]  ;;  %p1080_p4 = pnand %p1079_p1, %p1276_p3  ;;  %p1085_p2 = por %p1084_p9, %p1083_p11 }
  0x41   : > { %v355_v22 = vld [vmem:[%s1312_s23 + $0x20] sm:$0xff]  ;;  %v356_v24 = vld [vmem:[%s1312_s23 + $0x28] sm:$0xff]  ;;  %v366_v25 = vld [vmem:[%s1312_s23 + $0x78] sm:$0xff] }
  0x42   : > { %391 = vmatpush.msra.mxu0 %v378_v4  ;;  %814 = vmatpush.msra.mxu3 %v378_v4  ;;  %v357_v26 = vld [vmem:[%s1312_s23 + $0x30] sm:$0xff]  ;;  %v358_v27 = vld [vmem:[%s1312_s23 + $0x38] sm:$0xff]  ;;  %v481_v30 = vld [vmem:[#allocation7 + $0x68] sm:$0xff]  ;;  %p1081_p8 = pneg %p1080_p4 }
  0x43   : > { %v483_v28 = vld [vmem:[#allocation7 + $0x78] sm:$0xff]  ;;  %v482_v29 = vld [vmem:[#allocation7 + $0x70] sm:$0xff]  ;;  %v480_v31 = vld [vmem:[#allocation7 + $0x60] sm:$0xff] }
  0x44   : > { %392 = vmatpush.msra.mxu0 %v377_v5  ;;  %815 = vmatpush.msra.mxu3 %v377_v5  ;;  %v359_v32 = vld [vmem:[%s1312_s23 + $0x40] sm:$0xff]  ;;  %v479_v33 = vld [vmem:[#allocation7 + $0x58] sm:$0xff]  ;;  %v478_v34 = vld [vmem:[#allocation7 + $0x50] sm:$0xff]  ;;  %p1086_p10 = pnand %p1085_p2, %p1081_p8 }
  0x45   : > { %488 = vmatpush.msra.mxu1 %v483_v28  ;;  %v477_v35 = vld [vmem:[#allocation7 + $0x48] sm:$0xff]  ;;  %v476_v36 = vld [vmem:[#allocation7 + $0x40] sm:$0xff]  ;;  %v475_v38 = vld [vmem:[#allocation7 + $0x38] sm:$0xff] }
  0x46   : > { %393 = vmatpush.msra.mxu0 %v376_v6  ;;  %816 = vmatpush.msra.mxu3 %v376_v6  ;;  %v360_v37 = vld [vmem:[%s1312_s23 + $0x48] sm:$0xff]  ;;  %v474_v39 = vld [vmem:[#allocation7 + $0x30] sm:$0xff]  ;;  %v472_v41 = vld [vmem:[#allocation7 + $0x20] sm:$0xff] }
  0x47   : > { %489 = vmatpush.msra.mxu1 %v482_v29  ;;  %v473_v40 = vld [vmem:[#allocation7 + $0x28] sm:$0xff]  ;;  %v361_v42 = vld [vmem:[%s1312_s23 + $0x50] sm:$0xff]  ;;  %v471_v43 = vld [vmem:[#allocation7 + $0x18] sm:$0xff] }
  0x48   : > { %394 = vmatpush.msra.mxu0 %v375_v7  ;;  %817 = vmatpush.msra.mxu3 %v375_v7  ;;  %v362_v44 = vld [vmem:[%s1312_s23 + $0x58] sm:$0xff]  ;;  %v470_v45 = vld [vmem:[#allocation7 + $0x10] sm:$0xff]  ;;  %v469_v46 = vld [vmem:[#allocation7 + $0x8] sm:$0xff]  ;;  %s671_s23 = scalar_lea.sflag [#allocation4], %s1306_s15 }
  0x49   : > { %490 = vmatpush.msra.mxu1 %v481_v30  ;;  %v468_v47 = vld [vmem:[#allocation7] sm:$0xff] }
  0x4a   : > { %395 = vmatpush.msra.mxu0 %v374_v8  ;;  %818 = vmatpush.msra.mxu3 %v374_v8  ;;  %v1345_v48 = vld [vmem:[%s1425_s2] ss:$0 sm:$0xff] }
  0x4b   : > { %491 = vmatpush.msra.mxu1 %v480_v31 }
  0x4c   : > { %396 = vmatpush.msra.mxu0 %v373_v9  ;;  %819 = vmatpush.msra.mxu3 %v373_v9 }
  0x4d   : > { %492 = vmatpush.msra.mxu1 %v479_v33 }
  0x4e   : > { %397 = vmatpush.msra.mxu0 %v372_v10  ;;  %820 = vmatpush.msra.mxu3 %v372_v10 }
  0x4f   : > { %493 = vmatpush.msra.mxu1 %v478_v34 }
  0x50   : > { %398 = vmatpush.msra.mxu0 %v371_v11  ;;  %821 = vmatpush.msra.mxu3 %v371_v11 }
  0x51   : > { %494 = vmatpush.msra.mxu1 %v477_v35 }
  0x52   : > { %399 = vmatpush.msra.mxu0 %v370_v12  ;;  %822 = vmatpush.msra.mxu3 %v370_v12 }
  0x53   : > { %495 = vmatpush.msra.mxu1 %v476_v36 }
  0x54   : > { %400 = vmatpush.msra.mxu0 %v369_v13  ;;  %823 = vmatpush.msra.mxu3 %v369_v13 }
  0x55   : > { %496 = vmatpush.msra.mxu1 %v475_v38 }
  0x56   : > { %401 = vmatpush.msra.mxu0 %v368_v14  ;;  %824 = vmatpush.msra.mxu3 %v368_v14 }
  0x57   : > { %497 = vmatpush.msra.mxu1 %v474_v39 }
  0x58   : > { %402 = vmatpush.msra.mxu0 %v367_v15  ;;  %825 = vmatpush.msra.mxu3 %v367_v15 }
  0x59   : > { %403 = vmatmul.f32.vlgmr.msra.gmra.mxu0 %v351_v16  ;;  %439 = vmatmul.f32.vlgmr.msra.gmra.mxu3 %v363_v19 }
  0x5a   : > { %826 = vmatpush.msrb.mxu3 %v483_v28  ;;  %498 = vmatpush.msra.mxu1 %v473_v40  ;;  %v580_v28 = vld [vmem:[#allocation8 + $0x58] sm:$0xff] }
  0x5c   : > { %827 = vmatpush.msrb.mxu3 %v482_v29  ;;  %499 = vmatpush.msra.mxu1 %v472_v41  ;;  %v579_v29 = vld [vmem:[#allocation8 + $0x50] sm:$0xff] }
  0x5e   : > { %828 = vmatpush.msrb.mxu3 %v481_v30  ;;  %500 = vmatpush.msra.mxu1 %v471_v43  ;;  %v578_v30 = vld [vmem:[#allocation8 + $0x48] sm:$0xff] }
  0x60   : > { %829 = vmatpush.msrb.mxu3 %v480_v31  ;;  %501 = vmatpush.msra.mxu1 %v470_v45 }
  0x61   : > { %406 = vmatmul.f32.gmra.mxu0 %v352_v17  ;;  %442 = vmatmul.f32.gmra.mxu3 %v364_v21  ;;  %v584_v21 = vld [vmem:[#allocation8 + $0x78] sm:$0xff] }
  0x62   : > { %830 = vmatpush.msrb.mxu3 %v479_v33  ;;  %502 = vmatpush.msra.mxu1 %v469_v46  ;;  %v577_v33 = vld [vmem:[#allocation8 + $0x40] sm:$0xff] }
  0x63   : > { %589 = vmatpush.msra.mxu2 %v584_v21 }
  0x64   : > { %831 = vmatpush.msrb.mxu3 %v478_v34  ;;  %503 = vmatpush.msra.mxu1 %v468_v47 }
  0x66   : > { %832 = vmatpush.msrb.mxu3 %v477_v35  ;;  %v576_v35 = vld [vmem:[#allocation8 + $0x38] sm:$0xff] }
  0x68   : > { %833 = vmatpush.msrb.mxu3 %v476_v36  ;;  %v575_v36 = vld [vmem:[#allocation8 + $0x30] sm:$0xff] }
  0x69   : > { %409 = vmatmul.f32.gmra.mxu0 %v353_v18  ;;  %445 = vmatmul.f32.gmra.mxu3 %v365_v23  ;;  %v582_v23 = vld [vmem:[#allocation8 + $0x68] sm:$0xff] }
  0x6a   : > { %834 = vmatpush.msrb.mxu3 %v475_v38 }
  0x6c   : > { %835 = vmatpush.msrb.mxu3 %v474_v39 }
  0x6e   : > { %836 = vmatpush.msrb.mxu3 %v473_v40  ;;  %v573_v40 = vld [vmem:[#allocation8 + $0x20] sm:$0xff] }
  0x70   : > { %837 = vmatpush.msrb.mxu3 %v472_v41 }
  0x71   : > { %412 = vmatmul.f32.gmra.mxu0 %v354_v20  ;;  %448 = vmatmul.f32.gmra.mxu3 %v366_v25 }
  0x72   : > { %838 = vmatpush.msrb.mxu3 %v471_v43 }
  0x74   : > { %839 = vmatpush.msrb.mxu3 %v470_v45 }
  0x76   : > { %840 = vmatpush.msrb.mxu3 %v469_v46  ;;  %v571_v46 = vld [vmem:[#allocation8 + $0x10] sm:$0xff] }
  0x78   : > { %841 = vmatpush.msrb.mxu3 %v468_v47  ;;  %v570_v47 = vld [vmem:[#allocation8 + $0x8] sm:$0xff] }
  0x79   : > { %415 = vmatmul.f32.gmra.mxu0 %v355_v22  ;;  %v583_v22 = vld [vmem:[#allocation8 + $0x70] sm:$0xff] }
  0x7a   : > { %842 = vmatpush.msra.mxu3 %v584_v21  ;;  %590 = vmatpush.msra.mxu2 %v583_v22 }
  0x7c   : > { %843 = vmatpush.msra.mxu3 %v583_v22  ;;  %591 = vmatpush.msra.mxu2 %v582_v23 }
  0x7e   : > { %844 = vmatpush.msra.mxu3 %v582_v23 }
  0x81   : > { %418 = vmatmul.f32.gmra.mxu0 %v356_v24 }
  0x89   : > { %421 = vmatmul.f32.gmra.mxu0 %v357_v26  ;;  %v581_v26 = vld [vmem:[#allocation8 + $0x60] sm:$0xff] }
  0x8a   : > { %592 = vmatpush.msra.mxu2 %v581_v26  ;;  %845 = vmatpush.msra.mxu3 %v581_v26 }
  0x8c   : > { %593 = vmatpush.msra.mxu2 %v580_v28  ;;  %846 = vmatpush.msra.mxu3 %v580_v28 }
  0x8e   : > { %594 = vmatpush.msra.mxu2 %v579_v29  ;;  %847 = vmatpush.msra.mxu3 %v579_v29 }
  0x90   : > { %595 = vmatpush.msra.mxu2 %v578_v30  ;;  %848 = vmatpush.msra.mxu3 %v578_v30 }
  0x91   : > { %424 = vmatmul.f32.gmra.mxu0 %v358_v27 }
  0x92   : > { %596 = vmatpush.msra.mxu2 %v577_v33  ;;  %849 = vmatpush.msra.mxu3 %v577_v33 }
  0x94   : > { %597 = vmatpush.msra.mxu2 %v576_v35  ;;  %850 = vmatpush.msra.mxu3 %v576_v35 }
  0x96   : > { %598 = vmatpush.msra.mxu2 %v575_v36  ;;  %851 = vmatpush.msra.mxu3 %v575_v36 }
  0x99   : > { %427 = vmatmul.f32.gmra.mxu0 %v359_v32 }
  0xa1   : > { %430 = vmatmul.f32.gmra.mxu0 %v360_v37  ;;  %v574_v37 = vld [vmem:[#allocation8 + $0x28] sm:$0xff] }
  0xa2   : > { %599 = vmatpush.msra.mxu2 %v574_v37  ;;  %852 = vmatpush.msra.mxu3 %v574_v37 }
  0xa4   : > { %600 = vmatpush.msra.mxu2 %v573_v40  ;;  %853 = vmatpush.msra.mxu3 %v573_v40 }
  0xa9   : > { %433 = vmatmul.f32.gmra.mxu0 %v361_v42  ;;  %v572_v42 = vld [vmem:[#allocation8 + $0x18] sm:$0xff] }
  0xaa   : > { %601 = vmatpush.msra.mxu2 %v572_v42  ;;  %854 = vmatpush.msra.mxu3 %v572_v42 }
  0xac   : > { %602 = vmatpush.msra.mxu2 %v571_v46  ;;  %855 = vmatpush.msra.mxu3 %v571_v46 }
  0xae   : > { %603 = vmatpush.msra.mxu2 %v570_v47  ;;  %856 = vmatpush.msra.mxu3 %v570_v47 }
  0xb1   : > { %436 = vmatmul.f32.gmra.mxu0 %v362_v44 }
  0xd6   : > { %v404_v49 = vpop.f32.mrf.mxu0 }
  0xd7   : > { %v405_v50 = vadd.f32 %v1345_v48, %v404_v49  ;;  %v569_v49 = vld [vmem:[#allocation8] sm:$0xff] }
  0xd8   : > { %604 = vmatpush.msra.mxu2 %v569_v49  ;;  %857 = vmatpush.msra.mxu3 %v569_v49 }
  0xd9   : > { %v452_v51 = vmax.f32 %v405_v50, 0.0  ;;  %v940_v50 = vld [vmem:[%s1427_s4] ss:$0 sm:$0xff] }
  0xdb   : > { %504 = vmatmul.f32.vlgmr.msra.gmra.mxu1 %v452_v51 }
  0xdc   : > { %v440_v60 = vpop.f32.mrf.mxu3 }
  0xdd   : > { %v441_v62 = vadd.f32 %v1345_v48, %v440_v60 }
  0xde   : > { %v407_v52 = vpop.f32.mrf.mxu0 }
  0xdf   : > { %v408_v53 = vadd.f32 %v1345_v48, %v407_v52  ;;  %v464_v63 = vmax.f32 %v441_v62, 0.0 }
  0xe1   : > { %v453_v54 = vmax.f32 %v408_v53, 0.0  ;;  %540 = vmatmul.f32.vlgmr.msrb.gmra.mxu3 %v464_v63 }
  0xe3   : > { %507 = vmatmul.f32.gmra.mxu1 %v453_v54 }
  0xe4   : > { %v443_v2 = vpop.f32.mrf.mxu3 }
  0xe5   : > { %v444_v4 = vadd.f32 %v1345_v48, %v443_v2 }
  0xe6   : > { %v410_v55 = vpop.f32.mrf.mxu0 }
  0xe7   : > { %v411_v56 = vadd.f32 %v1345_v48, %v410_v55  ;;  %v465_v5 = vmax.f32 %v444_v4, 0.0 }
  0xe9   : > { %v454_v57 = vmax.f32 %v411_v56, 0.0  ;;  %543 = vmatmul.f32.gmra.mxu3 %v465_v5 }
  0xeb   : > { %510 = vmatmul.f32.gmra.mxu1 %v454_v57 }
  0xec   : > { %v446_v8 = vpop.f32.mrf.mxu3 }
  0xed   : > { %v447_v10 = vadd.f32 %v1345_v48, %v446_v8 }
  0xee   : > { %v413_v58 = vpop.f32.mrf.mxu0 }
  0xef   : > { %v414_v59 = vadd.f32 %v1345_v48, %v413_v58  ;;  %v466_v11 = vmax.f32 %v447_v10, 0.0 }
  0xf1   : > { %v455_v61 = vmax.f32 %v414_v59, 0.0  ;;  %546 = vmatmul.f32.gmra.mxu3 %v466_v11 }
  0xf3   : > { %513 = vmatmul.f32.gmra.mxu1 %v455_v61 }
  0xf4   : > { %v449_v14 = vpop.f32.mrf.mxu3 }
  0xf5   : > { %v450_v16 = vadd.f32 %v1345_v48, %v449_v14 }
  0xf6   : > { %v416_v0 = vpop.f32.mrf.mxu0 }
  0xf7   : > { %v417_v1 = vadd.f32 %v1345_v48, %v416_v0  ;;  %v467_v17 = vmax.f32 %v450_v16, 0.0 }
  0xf9   : > { %v456_v3 = vmax.f32 %v417_v1, 0.0  ;;  %549 = vmatmul.f32.gmra.mxu3 %v467_v17 }
  0xfb   : > { %516 = vmatmul.f32.gmra.mxu1 %v456_v3 }
  0xfe   : > { %v419_v6 = vpop.f32.mrf.mxu0 }
  0xff   : > { %v420_v7 = vadd.f32 %v1345_v48, %v419_v6 }
 0x101   : > { %v457_v9 = vmax.f32 %v420_v7, 0.0 }
 0x103   : > { %519 = vmatmul.f32.gmra.mxu1 %v457_v9 }
 0x106   : > { %v422_v12 = vpop.f32.mrf.mxu0 }
 0x107   : > { %v423_v13 = vadd.f32 %v1345_v48, %v422_v12 }
 0x109   : > { %v458_v15 = vmax.f32 %v423_v13, 0.0 }
 0x10b   : > { %522 = vmatmul.f32.gmra.mxu1 %v458_v15 }
 0x10e   : > { %v425_v18 = vpop.f32.mrf.mxu0 }
 0x10f   : > { %v426_v19 = vadd.f32 %v1345_v48, %v425_v18 }
 0x111   : > { %v459_v20 = vmax.f32 %v426_v19, 0.0 }
 0x113   : > { %525 = vmatmul.f32.gmra.mxu1 %v459_v20 }
 0x116   : > { %v428_v24 = vpop.f32.mrf.mxu0 }
 0x117   : > { %v429_v25 = vadd.f32 %v1345_v48, %v428_v24 }
 0x119   : > { %v460_v27 = vmax.f32 %v429_v25, 0.0 }
 0x11b   : > { %528 = vmatmul.f32.gmra.mxu1 %v460_v27 }
 0x11e   : > { %v431_v31 = vpop.f32.mrf.mxu0 }
 0x11f   : > { %v432_v32 = vadd.f32 %v1345_v48, %v431_v31 }
 0x121   : > { %v461_v34 = vmax.f32 %v432_v32, 0.0 }
 0x123   : > { %531 = vmatmul.f32.gmra.mxu1 %v461_v34  ;;  %v941_v34 = vld [vmem:[%s1429_s6] ss:$0 sm:$0xff] }
 0x126   : > { %v434_v38 = vpop.f32.mrf.mxu0 }
 0x127   : > { %v435_v39 = vadd.f32 %v1345_v48, %v434_v38 }
 0x129   : > { %v462_v41 = vmax.f32 %v435_v39, 0.0 }
 0x12b   : > { %534 = vmatmul.f32.gmra.mxu1 %v462_v41 }
 0x12e   : > { %v437_v43 = vpop.f32.mrf.mxu0 }
 0x12f   : > { %v438_v44 = vadd.f32 %v1345_v48, %v437_v43 }
 0x131   : > { %v463_v45 = vmax.f32 %v438_v44, 0.0 }
 0x133   : > { %537 = vmatmul.f32.gmra.mxu1 %v463_v45 }
 0x158   : > { %v505_v51 = vpop.f32.mrf.mxu1 }
 0x159   : > { %v506_v52 = vadd.f32 %v940_v50, %v505_v51 }
 0x15b   : > { %v553_v53 = vmax.f32 %v506_v52, 0.0 }
 0x15d   : > { %605 = vmatmul.f32.vlgmr.msra.gmra.mxu2 %v553_v53 }
 0x160   : > { %v508_v48 = vpop.f32.mrf.mxu1 }
 0x161   : > { %v509_v54 = vadd.f32 %v940_v50, %v508_v48 }
 0x163   : > { %v554_v55 = vmax.f32 %v509_v54, 0.0 }
 0x164   : > { %v541_v63 = vpop.f32.mrf.mxu3 }
 0x165   : > { %608 = vmatmul.f32.gmra.mxu2 %v554_v55  ;;  %v542_v1 = vadd.f32 %v940_v50, %v541_v63 }
 0x167   : > { %v565_v3 = vmax.f32 %v542_v1, 0.0 }
 0x168   : > { %v511_v56 = vpop.f32.mrf.mxu1 }
 0x169   : > { %v512_v57 = vadd.f32 %v940_v50, %v511_v56  ;;  %641 = vmatmul.f32.vlgmr.msra.gmra.mxu3 %v565_v3 }
 0x16b   : > { %v555_v58 = vmax.f32 %v512_v57, 0.0 }
 0x16c   : > { %v544_v5 = vpop.f32.mrf.mxu3 }
 0x16d   : > { %611 = vmatmul.f32.gmra.mxu2 %v555_v58  ;;  %v545_v7 = vadd.f32 %v940_v50, %v544_v5 }
 0x16f   : > { %v566_v9 = vmax.f32 %v545_v7, 0.0 }
 0x170   : > { %v514_v59 = vpop.f32.mrf.mxu1 }
 0x171   : > { %v515_v60 = vadd.f32 %v940_v50, %v514_v59  ;;  %644 = vmatmul.f32.gmra.mxu3 %v566_v9 }
 0x173   : > { %v556_v61 = vmax.f32 %v515_v60, 0.0 }
 0x174   : > { %v547_v11 = vpop.f32.mrf.mxu3 }
 0x175   : > { %614 = vmatmul.f32.gmra.mxu2 %v556_v61  ;;  %v548_v13 = vadd.f32 %v940_v50, %v547_v11 }
 0x177   : > { %v567_v15 = vmax.f32 %v548_v13, 0.0 }
 0x178   : > { %v517_v62 = vpop.f32.mrf.mxu1 }
 0x179   : > { %v518_v0 = vadd.f32 %v940_v50, %v517_v62  ;;  %647 = vmatmul.f32.gmra.mxu3 %v567_v15 }
 0x17b   : > { %v557_v2 = vmax.f32 %v518_v0, 0.0 }
 0x17c   : > { %v550_v17 = vpop.f32.mrf.mxu3 }
 0x17d   : > { %617 = vmatmul.f32.gmra.mxu2 %v557_v2  ;;  %v551_v19 = vadd.f32 %v940_v50, %v550_v17 }
 0x17f   : > { %v568_v21 = vmax.f32 %v551_v19, 0.0 }
 0x180   : > { %v520_v4 = vpop.f32.mrf.mxu1 }
 0x181   : > { %v521_v6 = vadd.f32 %v940_v50, %v520_v4  ;;  %650 = vmatmul.f32.gmra.mxu3 %v568_v21 }
 0x183   : > { %v558_v8 = vmax.f32 %v521_v6, 0.0 }
 0x185   : > { %620 = vmatmul.f32.gmra.mxu2 %v558_v8 }
 0x188   : > { %v523_v10 = vpop.f32.mrf.mxu1 }
 0x189   : > { %v524_v12 = vadd.f32 %v940_v50, %v523_v10 }
 0x18b   : > { %v559_v14 = vmax.f32 %v524_v12, 0.0 }
 0x18d   : > { %623 = vmatmul.f32.gmra.mxu2 %v559_v14 }
 0x190   : > { %v526_v16 = vpop.f32.mrf.mxu1 }
 0x191   : > { %v527_v18 = vadd.f32 %v940_v50, %v526_v16 }
 0x193   : > { %v560_v20 = vmax.f32 %v527_v18, 0.0 }
 0x195   : > { %626 = vmatmul.f32.gmra.mxu2 %v560_v20 }
 0x198   : > { %v529_v22 = vpop.f32.mrf.mxu1 }
 0x199   : > { %v530_v23 = vadd.f32 %v940_v50, %v529_v22 }
 0x19b   : > { %v561_v24 = vmax.f32 %v530_v23, 0.0 }
 0x19d   : > { %629 = vmatmul.f32.gmra.mxu2 %v561_v24 }
 0x1a0   : > { %v532_v25 = vpop.f32.mrf.mxu1 }
 0x1a1   : > { %v533_v26 = vadd.f32 %v940_v50, %v532_v25 }
 0x1a3   : > { %v562_v27 = vmax.f32 %v533_v26, 0.0 }
 0x1a5   : > { %632 = vmatmul.f32.gmra.mxu2 %v562_v27 }
 0x1a8   : > { %v535_v28 = vpop.f32.mrf.mxu1 }
 0x1a9   : > { %v536_v29 = vadd.f32 %v940_v50, %v535_v28 }
 0x1ab   : > { %v563_v30 = vmax.f32 %v536_v29, 0.0 }
 0x1ad   : > { %635 = vmatmul.f32.gmra.mxu2 %v563_v30 }
 0x1b0   : > { %v538_v31 = vpop.f32.mrf.mxu1 }
 0x1b1   : > { %v539_v32 = vadd.f32 %v940_v50, %v538_v31 }
 0x1b3   : > { %v564_v33 = vmax.f32 %v539_v32, 0.0 }
 0x1b5   : > { %638 = vmatmul.f32.gmra.mxu2 %v564_v33 }
 0x1e0   : > { %v606_v35 = vpop.f32.mrf.mxu2 }
 0x1e1   : > { %v607_v36 = vadd.f32 %v941_v34, %v606_v35 }
 0x1e3   : > { %654 = vst [vmem:[%s1371_s22] sm:$0xff] %v607_v36 }
 0x1e8   : > { %v609_v37 = vpop.f32.mrf.mxu2 }
 0x1e9   : > { %v610_v38 = vadd.f32 %v941_v34, %v609_v37 }
 0x1eb   : > { %655 = vst [vmem:[%s1371_s22 + $0x8] sm:$0xff] %v610_v38 }
 0x1ec   : > { %v642_v44 = vpop.f32.mrf.mxu3 }
 0x1ed   : > { %v643_v46 = vadd.f32 %v941_v34, %v642_v44 }
 0x1ef   : > { %666 = vst [vmem:[%s1371_s22 + $0x60] sm:$0xff] %v643_v46 }
 0x1f0   : > { %v612_v39 = vpop.f32.mrf.mxu2 }
 0x1f1   : > { %v613_v40 = vadd.f32 %v941_v34, %v612_v39 }
 0x1f3   : > { %656 = vst [vmem:[%s1371_s22 + $0x10] sm:$0xff] %v613_v40 }
 0x1f4   : > { %v645_v49 = vpop.f32.mrf.mxu3 }
 0x1f5   : > { %v646_v51 = vadd.f32 %v941_v34, %v645_v49 }
 0x1f7   : > { %667 = vst [vmem:[%s1371_s22 + $0x68] sm:$0xff] %v646_v51 }
 0x1f8   : > { %v615_v41 = vpop.f32.mrf.mxu2 }
 0x1f9   : > { %v616_v42 = vadd.f32 %v941_v34, %v615_v41 }
 0x1fb   : > { %657 = vst [vmem:[%s1371_s22 + $0x18] sm:$0xff] %v616_v42 }
 0x1fc   : > { %v648_v53 = vpop.f32.mrf.mxu3 }
 0x1fd   : > { %v649_v54 = vadd.f32 %v941_v34, %v648_v53 }
 0x1ff   : > { %668 = vst [vmem:[%s1371_s22 + $0x70] sm:$0xff] %v649_v54 }
 0x200   : > { %v618_v43 = vpop.f32.mrf.mxu2 }
 0x201   : > { %v619_v45 = vadd.f32 %v941_v34, %v618_v43 }
 0x203   : > { %658 = vst [vmem:[%s1371_s22 + $0x20] sm:$0xff] %v619_v45 }
 0x204   : > { %v651_v56 = vpop.f32.mrf.mxu3 }
 0x205   : > { %v652_v58 = vadd.f32 %v941_v34, %v651_v56 }
 0x207   : > { %669 = vst [vmem:[%s1371_s22 + $0x78] sm:$0xff] %v652_v58 }
 0x208   : > { %v621_v47 = vpop.f32.mrf.mxu2 }
 0x209   : > { %v622_v50 = vadd.f32 %v941_v34, %v621_v47 }
 0x20b   : > { %659 = vst [vmem:[%s1371_s22 + $0x28] sm:$0xff] %v622_v50 }
 0x210   : > { %v624_v52 = vpop.f32.mrf.mxu2 }
 0x211   : > { %v625_v48 = vadd.f32 %v941_v34, %v624_v52 }
 0x213   : > { %660 = vst [vmem:[%s1371_s22 + $0x30] sm:$0xff] %v625_v48 }
 0x218   : > { %v627_v55 = vpop.f32.mrf.mxu2 }
 0x219   : > { %v628_v57 = vadd.f32 %v941_v34, %v627_v55 }
 0x21b   : > { %661 = vst [vmem:[%s1371_s22 + $0x38] sm:$0xff] %v628_v57 }
 0x220   : > { %v630_v59 = vpop.f32.mrf.mxu2 }
 0x221   : > { %v631_v60 = vadd.f32 %v941_v34, %v630_v59 }
 0x223   : > { %662 = vst [vmem:[%s1371_s22 + $0x40] sm:$0xff] %v631_v60 }
 0x228   : > { %v633_v61 = vpop.f32.mrf.mxu2 }
 0x229   : > { %v634_v62 = vadd.f32 %v941_v34, %v633_v61 }
 0x22b   : > { %663 = vst [vmem:[%s1371_s22 + $0x48] sm:$0xff] %v634_v62 }
 0x230   : > { %v636_v63 = vpop.f32.mrf.mxu2 }
 0x231   : > { %v637_v0 = vadd.f32 %v941_v34, %v636_v63 }
 0x233   : > { %664 = vst [vmem:[%s1371_s22 + $0x50] sm:$0xff] %v637_v0 }
 0x238   : > { %v639_v1 = vpop.f32.mrf.mxu2 }
 0x239   : > { %v640_v2 = vadd.f32 %v941_v34, %v639_v1 }
 0x23b   : > { %665 = vst [vmem:[%s1371_s22 + $0x58] sm:$0xff] %v640_v2 }
 0x23c   : > { %1089 = shalt.err (!%p1086_p10)
}
 0x23d   : > { %s1143_s15 = smov 128   ;;  %s1144_s22 = smov 8  }
 0x23e   : > { %872 = dma.vmem_to_hbm [thread:$0]  (%p1276_p3), %s684_s1, 2048, %s686_s20, %s671_s23, %s1143_s15, %s1143_s15, %s1144_s22  }
 0x23f PF: > { %s700_s29 = sand.u32 1, %s1124_s24   ;;  %p1443_p12 = scmp.ge.s32.totalorder %s1136_s27, 2 }
 0x240   : > { %s701_s9 = scalar_lea.sflag [#allocation4], %s700_s29 }
 0x241   : > { %p889_p13 = pnand %p1443_p12, %p1220_p6 }
 0x243   : > { %p890_p0 = pneg %p889_p13 }
 0x245   : > { %1119 = dma.done.wait (%p890_p0), %s701_s9, 2048  }
 0x246   : > { %1121 = vsyncadd (%p890_p0), %s701_s9, 4294965248  ;;  %p22_p5 = scmp.ge.s32.totalorder %s1258_s13, 4   ;;  %s1444_s24 = smov %s1128_s25 }
 0x247   : > { %s1445_s25 = smov %s1132_s26  ;;  %s1446_s26 = smov %s1272_s17 }
 0x248   : > { %s1447_s27 = smov %s1258_s13  ;;  %24 = sbr.rel (!%p22_p5) target bundleno = 9 (0x9), region = 105 }
 0x24d   :  { %707 = vsyncpa [#allocation3], 1 }
 0x24e   :  { %709 = vsyncpa [#allocation3 + $0x1], 1 }
 0x24f   :  { %710 = vsyncpa [#allocation6], 1 }
 0x250   :  { %711 = vsyncpa [#allocation9], 1 }
 0x251   :  { %712 = vsyncpa [#allocation4], 1 }
 0x252   :  { %714 = vsyncpa [#allocation4 + $0x1], 1 }

</bundles_post_ra>
